<compile_context>
chip_gen: v7x
topology: tpu7x:2x2x1
jax: 0.10.0
libtpu: 0.0.40
codegen_flags: <defaults>
</compile_context>

<pallas_src>
import functools

import numpy as np
import jax
import jax.numpy as jnp
from jax.experimental import pallas as pl
from jax.experimental.pallas import tpu as pltpu

_BN_EPS = 1e-5


def _round_up(a, b):
    return (a + b - 1) // b * b


def _non_local_kernel(x_ref, w3_ref, b3_ref, wf_ref, bf_ref, o_ref,
                      s_ref, th_ref, *, n_true, n_tile):
    ph = pl.program_id(1)   # 0 = reduce (compute s, stash theta), 1 = apply
    nt = pl.program_id(2)   # N-tile index

    @pl.when(jnp.logical_and(ph == 0, nt == 0))
    def _():
        s_ref[...] = jnp.zeros_like(s_ref)

    @pl.when(ph == 0)
    def _():
        x = x_ref[0]                                                     # (C, n_tile)
        # Single MXU matmul for the three 1x1 projections (rows: 0=g, 1=theta, 2=phi).
        proj = jnp.dot(w3_ref[...], x, preferred_element_type=jnp.float32) + b3_ref[...]
        g_row = proj[0:1, :]
        th_row = proj[1:2, :]
        ph_row = proj[2:3, :]

        prod = ph_row * g_row
        if n_true % n_tile != 0:
            # Mask host-padded lanes out of the phi*g partial sum.
            lane = nt * n_tile + jax.lax.broadcasted_iota(jnp.int32, (1, n_tile), 1)
            prod = jnp.where(lane < n_true, prod, 0.0)

        s_ref[...] += jnp.sum(prod, keepdims=True)                       # (1, 1) accumulator
        th_ref[nt] = th_row                                              # stash theta tile

    @pl.when(ph == 1)
    def _():
        x = x_ref[0]                                                     # (C, n_tile)
        s = s_ref[...] * (1.0 / n_true)                                  # (1, 1), true-N normalization
        wfs = wf_ref[...] * s                                            # (C, 1): scale C elems first
        o_ref[0] = (wfs * th_ref[nt] + bf_ref[...] + x).astype(o_ref.dtype)


def non_local_forward(x, params, *, max_tile=1024):
    """x: (B, C, H, W) float32. Returns (B, C, H, W)."""
    B, C, H, W = x.shape
    N = H * W

    # Lane-dense tiling: pad N to a multiple of 128, pick the largest tile (<= max_tile,
    # multiple of 128) that divides the padded N so no extra padding is needed.
    n_pad = _round_up(N, 128)
    n_tile = 128
    for k in range(max(1, max_tile // 128), 0, -1):
        t = 128 * k
        if n_pad % t == 0:
            n_tile = t
            break
    nt_count = n_pad // n_tile

    x_flat = x.reshape(B, C, N)
    if n_pad != N:
        x_flat = jnp.pad(x_flat, ((0, 0), (0, 0), (0, n_pad - N)))

    # --- Host-side parameter fusion -------------------------------------------------
    # Fold eval-mode BatchNorm into the 1->C conv weight/bias.
    inv_std = jax.lax.rsqrt(params["var"] + _BN_EPS)                                   # (C, 1)
    w_fold = params["wW"] * params["gamma"] * inv_std                                  # (C, 1)
    b_fold = (params["bW"] - params["mean"]) * params["gamma"] * inv_std + params["beta"]  # (C, 1)

    # Stack the three C->1 projections into one (8, C) weight / (8, 1) bias (full sublane).
    w3 = jnp.zeros((8, C), jnp.float32)
    w3 = w3.at[0].set(params["wg"][0]).at[1].set(params["wth"][0]).at[2].set(params["wph"][0])
    b3 = jnp.zeros((8, 1), jnp.float32)
    b3 = b3.at[0].set(params["bg"][0]).at[1].set(params["bth"][0]).at[2].set(params["bph"][0])
    # ---------------------------------------------------------------------------------

    block_bytes = C * n_tile * 4
    vmem_limit = int(min(64 << 20, max(24 << 20, 5 * block_bytes + (2 << 20))))

    kernel = functools.partial(_non_local_kernel, n_true=N, n_tile=n_tile)

    out = pl.pallas_call(
        kernel,
        out_shape=jax.ShapeDtypeStruct((B, C, n_pad), x.dtype),
        grid_spec=pltpu.PrefetchScalarGridSpec(
            num_scalar_prefetch=0,
            grid=(B, 2, nt_count),
            in_specs=[
                pl.BlockSpec((1, C, n_tile), lambda b, ph, nt: (b, 0, nt)),   # x, lane-dense tiles
                pl.BlockSpec((8, C), lambda b, ph, nt: (0, 0)),               # stacked proj weights
                pl.BlockSpec((8, 1), lambda b, ph, nt: (0, 0)),               # stacked proj biases
                pl.BlockSpec((C, 1), lambda b, ph, nt: (0, 0)),               # BN-folded conv weight
                pl.BlockSpec((C, 1), lambda b, ph, nt: (0, 0)),               # BN-folded conv bias
            ],
            # Output block stays resident through phase 0 (ph*nt == 0), is fully written in
            # phase 1, and is DMA'd back to HBM exactly once per tile.
            out_specs=pl.BlockSpec((1, C, n_tile), lambda b, ph, nt: (b, 0, ph * nt)),
            scratch_shapes=[
                pltpu.VMEM((1, 1), jnp.float32),                  # s = dot(phi, g) accumulator
                pltpu.VMEM((nt_count, 1, n_tile), jnp.float32),   # theta tiles (~4*N bytes)
            ],
        ),
        compiler_params=pltpu.CompilerParams(
            dimension_semantics=("parallel", "arbitrary", "arbitrary"),
            vmem_limit_bytes=vmem_limit,
        ),
        input_output_aliases={0: 0},
    )(x_flat, w3, b3, w_fold, b_fold)

    return out[:, :, :N].reshape(B, C, H, W)


def init_params(key, in_channels):
    """Parameter init matching the PyTorch module shapes (inter_channels = 1).

    NOTE: the PyTorch module constant-inits BN gamma=beta=0 (which zeroes the non-local
    branch); for a *meaningful* numerical check we randomize gamma/beta/mean/var here.
    """
    C = in_channels
    k = jax.random.split(key, 12)
    p = {
        # g / theta / phi: Conv2d(C, 1, 1) -> weight (1, C), bias (1, 1)
        "wg":  jax.random.normal(k[0], (1, C), jnp.float32) * 0.1,
        "bg":  jax.random.normal(k[1], (1, 1), jnp.float32) * 0.1,
        "wth": jax.random.normal(k[2], (1, C), jnp.float32) * 0.1,
        "bth": jax.random.normal(k[3], (1, 1), jnp.float32) * 0.1,
        "wph": jax.random.normal(k[4], (1, C), jnp.float32) * 0.1,
        "bph": jax.random.normal(k[5], (1, 1), jnp.float32) * 0.1,
        # W[0]: Conv2d(1, C, 1) -> weight (C, 1), bias (C, 1)
        "wW":  jax.random.normal(k[6], (C, 1), jnp.float32) * 0.1,
        "bW":  jax.random.normal(k[7], (C, 1), jnp.float32) * 0.1,
        # W[1]: BatchNorm2d(C), eval-mode running stats — randomized so the check is not vacuous.
        "gamma": jax.random.normal(k[8], (C, 1), jnp.float32) * 0.5 + 1.0,
        "beta":  jax.random.normal(k[9], (C, 1), jnp.float32) * 0.2,
        "mean":  jax.random.normal(k[10], (C, 1), jnp.float32) * 0.1,
        "var":   jax.random.uniform(k[11], (C, 1), jnp.float32, 0.5, 1.5),
    }
    return p


def non_local_reference(x, p):
    """Pure-JAX reference implementing the original (unfused) math with the full (N, N) f."""
    B, C, H, W = x.shape
    N = H * W
    xf = x.reshape(B, C, N)
    g = jnp.einsum("oc,bcn->bon", p["wg"], xf) + p["bg"][None]        # (B,1,N)
    th = jnp.einsum("oc,bcn->bon", p["wth"], xf) + p["bth"][None]     # (B,1,N)
    ph = jnp.einsum("oc,bcn->bon", p["wph"], xf) + p["bph"][None]     # (B,1,N)
    g_x = jnp.transpose(g, (0, 2, 1))                                 # (B,N,1)
    theta_x = jnp.transpose(th, (0, 2, 1))                            # (B,N,1)
    f = jnp.matmul(theta_x, ph) / N                                   # (B,N,N)
    y = jnp.matmul(f, g_x)                                            # (B,N,1)
    y = jnp.transpose(y, (0, 2, 1))                                   # (B,1,N)
    wy = jnp.einsum("co,bon->bcn", p["wW"], y) + p["bW"][None]        # (B,C,N)
    wy = (wy - p["mean"][None]) / jnp.sqrt(p["var"][None] + _BN_EPS) * p["gamma"][None] + p["beta"][None]
    return (wy + xf).reshape(B, C, H, W)


if __name__ == "__main__":
    key = jax.random.PRNGKey(0)
    kx, kp, kx2 = jax.random.split(key, 3)

    # Primary check: N a multiple of 128 (no padding), single N-tile.
    B, C, H, W = 2, 4, 16, 16
    x = jax.random.normal(kx, (B, C, H, W), jnp.float32)
    params = init_params(kp, C)

    out = non_local_forward(x, params)
    out = jax.block_until_ready(out)
    ref = non_local_reference(x, params)
    np.testing.assert_allclose(np.asarray(out), np.asarray(ref), rtol=1e-4, atol=1e-4)

    # Secondary check: N not a multiple of 128 (host padding + in-kernel lane masking),
    # and a forced 128-lane tile so the multi-tile s accumulation / theta stash path runs.
    H2, W2 = 15, 15
    x2 = jax.random.normal(kx2, (B, C, H2, W2), jnp.float32)
    out2 = non_local_forward(x2, params, max_tile=128)
    out2 = jax.block_until_ready(out2)
    ref2 = non_local_reference(x2, params)
    np.testing.assert_allclose(np.asarray(out2), np.asarray(ref2), rtol=1e-4, atol=1e-4)

    print("KERNEL_OK")
</pallas_src>

<mosaic_0001>
module attributes {stable_mosaic.version = 11 : i64} {
  func.func @_non_local_kernel(%arg0: i32, %arg1: i32, %arg2: i32, %arg3: memref<1x4x256xf32, #tpu.memory_space<vmem>>, %arg4: memref<8x4xf32, #tpu.memory_space<vmem>>, %arg5: memref<8x1xf32, #tpu.memory_space<vmem>>, %arg6: memref<4x1xf32, #tpu.memory_space<vmem>>, %arg7: memref<4x1xf32, #tpu.memory_space<vmem>>, %arg8: memref<1x4x256xf32, #tpu.memory_space<vmem>>, %arg9: memref<1x1xf32, #tpu.memory_space<vmem>>, %arg10: memref<1x1x256xf32, #tpu.memory_space<vmem>>) attributes {dimension_semantics = [#tpu.dimension_semantics<parallel>, #tpu.dimension_semantics<arbitrary>, #tpu.dimension_semantics<arbitrary>], iteration_bounds = array<i64: 2, 2, 1>, scalar_prefetch = 0 : i64, scratch_operands = 2 : i64, tpu.core_type = #tpu.core_type<tc>, window_params = [{transform_indices = @transform_0, window_bounds = array<i64: 1, 4, 256>}, {pipeline_mode = #tpu.pipeline_mode<synchronous>, transform_indices = @transform_1, window_bounds = array<i64: 8, 4>}, {pipeline_mode = #tpu.pipeline_mode<synchronous>, transform_indices = @transform_2, window_bounds = array<i64: 8, 1>}, {pipeline_mode = #tpu.pipeline_mode<synchronous>, transform_indices = @transform_3, window_bounds = array<i64: 4, 1>}, {pipeline_mode = #tpu.pipeline_mode<synchronous>, transform_indices = @transform_4, window_bounds = array<i64: 4, 1>}, {transform_indices = @transform_5, window_bounds = array<i64: 1, 4, 256>}]} {
    %c0_i32 = arith.constant 0 : i32
    %0 = arith.cmpi eq, %arg1, %c0_i32 : i32
    %c0_i32_0 = arith.constant 0 : i32
    %1 = arith.cmpi eq, %arg2, %c0_i32_0 : i32
    %2 = arith.andi %0, %1 : i1
    %3 = arith.extui %2 : i1 to i32
    %c0_i32_1 = arith.constant 0 : i32
    %4 = arith.cmpi ne, %3, %c0_i32_1 : i32
    scf.if %4 {
      %cst = arith.constant 0.000000e+00 : f32
      %11 = vector.broadcast %cst : f32 to vector<1x1xf32>
      %c0 = arith.constant 0 : index
      %c0_5 = arith.constant 0 : index
      %12 = vector.load %arg9[%c0, %c0_5] : memref<1x1xf32, #tpu.memory_space<vmem>>, vector<1x1xf32>
      tpu.vector_store %arg9[%c0, %c0_5], %11 {strides = array<i32>} : memref<1x1xf32, #tpu.memory_space<vmem>>, vector<1x1xf32>,
    } else {
    }
    %c0_i32_2 = arith.constant 0 : i32
    %5 = arith.cmpi eq, %arg1, %c0_i32_2 : i32
    %6 = arith.extui %5 : i1 to i32
    %c0_i32_3 = arith.constant 0 : i32
    %7 = arith.cmpi ne, %6, %c0_i32_3 : i32
    scf.if %7 {
      %c0 = arith.constant 0 : index
      %c0_5 = arith.constant 0 : index
      %c0_6 = arith.constant 0 : index
      %11 = vector.load %arg3[%c0, %c0_5, %c0_6] : memref<1x4x256xf32, #tpu.memory_space<vmem>>, vector<1x4x256xf32>
      %12 = vector.shape_cast %11 : vector<1x4x256xf32> to vector<4x256xf32>
      %c0_7 = arith.constant 0 : index
      %c0_8 = arith.constant 0 : index
      %13 = vector.load %arg4[%c0_7, %c0_8] : memref<8x4xf32, #tpu.memory_space<vmem>>, vector<8x4xf32>
      %cst = arith.constant dense<0.000000e+00> : vector<8x256xf32>
      %14 = tpu.matmul %13, %12, %cst {dimension_numbers = #tpu.dot_dimension_numbers<[1], [0], [0], [1], [0, 0, 1, 1], [], []>} : vector<8x4xf32>, vector<4x256xf32>, vector<8x256xf32> -> vector<8x256xf32>
      %c0_9 = arith.constant 0 : index
      %c0_10 = arith.constant 0 : index
      %15 = vector.load %arg5[%c0_9, %c0_10] : memref<8x1xf32, #tpu.memory_space<vmem>>, vector<8x1xf32>
      %16 = vector.broadcast %15 : vector<8x1xf32> to vector<8x256xf32>
      %17 = arith.addf %14, %16 : vector<8x256xf32>
      %18 = vector.extract_strided_slice %17 {offsets = [0, 0], sizes = [1, 256], strides = [1, 1]} : vector<8x256xf32> to vector<1x256xf32>
      %19 = vector.extract_strided_slice %17 {offsets = [1, 0], sizes = [1, 256], strides = [1, 1]} : vector<8x256xf32> to vector<1x256xf32>
      %20 = vector.extract_strided_slice %17 {offsets = [2, 0], sizes = [1, 256], strides = [1, 1]} : vector<8x256xf32> to vector<1x256xf32>
      %21 = arith.mulf %20, %18 : vector<1x256xf32>
      %c0_11 = arith.constant 0 : index
      %c0_12 = arith.constant 0 : index
      %22 = vector.load %arg9[%c0_11, %c0_12] : memref<1x1xf32, #tpu.memory_space<vmem>>, vector<1x1xf32>
      %23 = vector.shape_cast %21 : vector<1x256xf32> to vector<1x1x256xf32>
      %cst_13 = arith.constant dense<0.000000e+00> : vector<1xf32>
      %24 = vector.multi_reduction <add>, %23, %cst_13 [1, 2] : vector<1x1x256xf32> to vector<1xf32>
      %25 = vector.shape_cast %24 : vector<1xf32> to vector<1x1x1xf32>
      %26 = vector.extract %25[0, 0, 0] : f32 from vector<1x1x1xf32>
      %27 = vector.broadcast %26 : f32 to vector<1x1xf32>
      %28 = arith.addf %22, %27 : vector<1x1xf32>
      %c0_14 = arith.constant 0 : index
      %c0_15 = arith.constant 0 : index
      %29 = vector.load %arg9[%c0_14, %c0_15] : memref<1x1xf32, #tpu.memory_space<vmem>>, vector<1x1xf32>
      tpu.vector_store %arg9[%c0_14, %c0_15], %28 {strides = array<i32>} : memref<1x1xf32, #tpu.memory_space<vmem>>, vector<1x1xf32>,
      %30 = arith.index_cast %arg2 : i32 to index
      %c0_16 = arith.constant 0 : index
      %c0_17 = arith.constant 0 : index
      %31 = vector.load %arg10[%30, %c0_16, %c0_17] : memref<1x1x256xf32, #tpu.memory_space<vmem>>, vector<1x1x256xf32>
      %32 = vector.shape_cast %31 : vector<1x1x256xf32> to vector<1x256xf32>
      %33 = vector.shape_cast %19 : vector<1x256xf32> to vector<1x1x256xf32>
      tpu.vector_store %arg10[%30, %c0_16, %c0_17], %33 {strides = array<i32>} : memref<1x1x256xf32, #tpu.memory_space<vmem>>, vector<1x1x256xf32>,
    } else {
    }
    %c1_i32 = arith.constant 1 : i32
    %8 = arith.cmpi eq, %arg1, %c1_i32 : i32
    %9 = arith.extui %8 : i1 to i32
    %c0_i32_4 = arith.constant 0 : i32
    %10 = arith.cmpi ne, %9, %c0_i32_4 : i32
    scf.if %10 {
      %c0 = arith.constant 0 : index
      %c0_5 = arith.constant 0 : index
      %c0_6 = arith.constant 0 : index
      %11 = vector.load %arg3[%c0, %c0_5, %c0_6] : memref<1x4x256xf32, #tpu.memory_space<vmem>>, vector<1x4x256xf32>
      %12 = vector.shape_cast %11 : vector<1x4x256xf32> to vector<4x256xf32>
      %c0_7 = arith.constant 0 : index
      %c0_8 = arith.constant 0 : index
      %13 = vector.load %arg9[%c0_7, %c0_8] : memref<1x1xf32, #tpu.memory_space<vmem>>, vector<1x1xf32>
      %cst = arith.constant 3.906250e-03 : f32
      %14 = vector.broadcast %cst : f32 to vector<1x1xf32>
      %15 = arith.mulf %13, %14 : vector<1x1xf32>
      %c0_9 = arith.constant 0 : index
      %c0_10 = arith.constant 0 : index
      %16 = vector.load %arg6[%c0_9, %c0_10] : memref<4x1xf32, #tpu.memory_space<vmem>>, vector<4x1xf32>
      %17 = vector.broadcast %15 : vector<1x1xf32> to vector<4x1xf32>
      %18 = arith.mulf %16, %17 : vector<4x1xf32>
      %19 = arith.index_cast %arg2 : i32 to index
      %c0_11 = arith.constant 0 : index
      %c0_12 = arith.constant 0 : index
      %20 = vector.load %arg10[%19, %c0_11, %c0_12] : memref<1x1x256xf32, #tpu.memory_space<vmem>>, vector<1x1x256xf32>
      %21 = vector.shape_cast %20 : vector<1x1x256xf32> to vector<1x256xf32>
      %22 = vector.broadcast %18 : vector<4x1xf32> to vector<4x256xf32>
      %23 = vector.broadcast %21 : vector<1x256xf32> to vector<4x256xf32>
      %24 = arith.mulf %22, %23 : vector<4x256xf32>
      %c0_13 = arith.constant 0 : index
      %c0_14 = arith.constant 0 : index
      %25 = vector.load %arg7[%c0_13, %c0_14] : memref<4x1xf32, #tpu.memory_space<vmem>>, vector<4x1xf32>
      %26 = vector.broadcast %25 : vector<4x1xf32> to vector<4x256xf32>
      %27 = arith.addf %24, %26 : vector<4x256xf32>
      %28 = arith.addf %27, %12 : vector<4x256xf32>
      %c0_15 = arith.constant 0 : index
      %c0_16 = arith.constant 0 : index
      %c0_17 = arith.constant 0 : index
      %29 = vector.load %arg8[%c0_15, %c0_16, %c0_17] : memref<1x4x256xf32, #tpu.memory_space<vmem>>, vector<1x4x256xf32>
      %30 = vector.shape_cast %29 : vector<1x4x256xf32> to vector<4x256xf32>
      %31 = vector.shape_cast %28 : vector<4x256xf32> to vector<1x4x256xf32>
      tpu.vector_store %arg8[%c0_15, %c0_16, %c0_17], %31 {strides = array<i32>} : memref<1x4x256xf32, #tpu.memory_space<vmem>>, vector<1x4x256xf32>,
    } else {
    }
    return
  }
  func.func @transform_0(%arg0: i32, %arg1: i32, %arg2: i32) -> (i32, i32, i32) {
    %c0_i32 = arith.constant 0 : i32
    %c0_i32_0 = arith.constant 0 : i32
    return %arg0, %c0_i32, %arg2 : i32, i32, i32
  }
  func.func @transform_1(%arg0: i32, %arg1: i32, %arg2: i32) -> (i32, i32) {
    %c0_i32 = arith.constant 0 : i32
    %c0_i32_0 = arith.constant 0 : i32
    %c0_i32_1 = arith.constant 0 : i32
    return %c0_i32, %c0_i32_0 : i32, i32
  }
  func.func @transform_2(%arg0: i32, %arg1: i32, %arg2: i32) -> (i32, i32) {
    %c0_i32 = arith.constant 0 : i32
    %c0_i32_0 = arith.constant 0 : i32
    %c0_i32_1 = arith.constant 0 : i32
    return %c0_i32, %c0_i32_0 : i32, i32
  }
  func.func @transform_3(%arg0: i32, %arg1: i32, %arg2: i32) -> (i32, i32) {
    %c0_i32 = arith.constant 0 : i32
    %c0_i32_0 = arith.constant 0 : i32
    %c0_i32_1 = arith.constant 0 : i32
    return %c0_i32, %c0_i32_0 : i32, i32
  }
  func.func @transform_4(%arg0: i32, %arg1: i32, %arg2: i32) -> (i32, i32) {
    %c0_i32 = arith.constant 0 : i32
    %c0_i32_0 = arith.constant 0 : i32
    %c0_i32_1 = arith.constant 0 : i32
    return %c0_i32, %c0_i32_0 : i32, i32
  }
  func.func @transform_5(%arg0: i32, %arg1: i32, %arg2: i32) -> (i32, i32, i32) {
    %0 = arith.muli %arg1, %arg2 : i32
    %c0_i32 = arith.constant 0 : i32
    %c0_i32_0 = arith.constant 0 : i32
    return %arg0, %c0_i32, %0 : i32, i32, i32
  }
}

</mosaic_0001>

<bundles_post_ra>
// kernel: tpu_custom_call.1
= control target key start
LH: loop header
LB: loop body
LE: loop exit
PB: predicated region body
PF: predicated region fallthrough
CT: control target
= control target key end

     0   :  { %10 = vsyncpa [#allocation5], 0  ;;  %s1081_s0 = inlined_call_operand.hbm [shape: f32[2,4,256], index: 0, kind: input, shape index: {}, may-alias: {0,5}]   ;;  %s1082_s1 = inlined_call_operand.vmem [shape: f32[8,4], index: 1, kind: input, shape index: {}]   ;;  %s1083_s2 = inlined_call_operand.vmem [shape: f32[8,1], index: 2, kind: input, shape index: {}]   ;;  %s1084_s3 = inlined_call_operand.vmem [shape: f32[4,1], index: 3, kind: input, shape index: {}]   ;;  %s1085_s4 = inlined_call_operand.vmem [shape: f32[4,1], index: 4, kind: input, shape index: {}]   ;;  %s1086_s5 = inlined_call_operand.hbm [shape: f32[2,4,256], index: 5, kind: output, shape index: {}, may-alias: {0,5}]  }
   0x1   :  { %12 = vsyncpa [#allocation5 + $0x1], 0 }
   0x2   :  { %13 = vsyncpa [#allocation6], 0 }
   0x3   :  { %15 = vsyncpa [#allocation6 + $0x1], 0  ;;  %s874_s18 = smov 0   ;;  %s876_s19 = smov 0  }
   0x4   :  { %s878_s20 = smov 0   ;;  %s880_s21 = smov 0  }
   0x5   :  { %s882_s22 = smov 0   ;;  %s884_s23 = smov 0  }
   0x6   :  { %s886_s24 = smov 0   ;;  %s888_s25 = smov 0  }
   0x7 LB: > { %s594_s26 = sadd.s32 4294967295, %s835_s25   ;;  %s595_s27 = sadd.s32 4294967294, %s835_s25   ;;  %s835_s25 = sphi %s888_s25, %s21_s25   ;;  %s831_s24 = sphi %s886_s24, %s1103_s24   ;;  %s827_s23 = sphi %s884_s23, %s1102_s23   ;;  %s823_s22 = sphi %s882_s22, %s1101_s22   ;;  %s819_s21 = sphi %s880_s21, %s1100_s21   ;;  %s815_s20 = sphi %s878_s20, %s1099_s20   ;;  %s811_s19 = sphi %s876_s19, %s1098_s19   ;;  %s807_s18 = sphi %s874_s18, %s1097_s18  }
   0x8   : > { %s36_s28 = sadd.s32 1, %s827_s23  ;;  %s40_s29 = sadd.s32 1, %s831_s24 }
   0x9   : > { %p38_p0 = scmp.ge.s32.totalorder %s36_s28, 2  ;;  %s49_s30 = sadd.s32 1, %s815_s20 }
   0xa   : > { %p56_p1 = scmp.ne.s32.totalorder %s815_s20, %s811_s19  ;;  %p57_p2 = scmp.eq.s32.totalorder %s835_s25, 0 }
   0xb   : > { %s1105_s28 = smov (%p38_p0, %s36_s28), 0  ;;  %s1107_s29 = smov (!%p38_p0, %s40_s29), %s831_s24 }
   0xc   : > { %p925_p3 = por %p57_p2, %p56_p1  ;;  %p62_p4 = scmp.ne.s32.totalorder %s811_s19, %s807_s18 }
   0xd   : > { %p42_p5 = scmp.ge.s32.totalorder %s1107_s29, 2  ;;  %p63_p6 = scmp.eq.s32.totalorder %s594_s26, 0 }
   0xe   : > { %p174_p7 = scmp.eq.s32.totalorder %s594_s26, 3  ;;  %p180_p8 = scmp.eq.s32.totalorder %s595_s27, 3 }
   0xf   : > { %s1109_s29 = smov (%p42_p5, %s1107_s29), 0  ;;  %p933_p9 = por %p63_p6, %p62_p4 }
  0x10   : > { %p937_p10 = por %p174_p7, %p56_p1  ;;  %s44_s9 = ssub.s32 %s831_s24, %s1109_s29 }
  0x11   : > { %p943_p11 = por %p180_p8, %p62_p4  ;;  %p47_p12 = scmp.eq.s32.totalorder %s44_s9, 0 }
  0x12   : > { %s1090_s8 = scalar_select %p937_p10, 1, 0 }
  0x13   : > { %s1091_s10 = scalar_select %p943_p11, 1, 0 }
  0x14   : > { %p632_p13 = scmp.lt.s32.totalorder %s835_s25, 4  ;;  %s212_s11 = sand.u32 1, %s815_s20  }
  0x15   : > { %s950_s12 = scalar_select %p47_p12, %s815_s20, %s49_s30  }
  0x16   : > { %s598_s13 = sshll.u32 %s212_s11, 3  ;;  %s615_s14 = sshll.u32 %s831_s24, 7 }
  0x17   : > { %s956_s17 = scalar_lea.hbm %s1081_s0, %s615_s14  ;;  %s216_s26 = scalar_lea.vmem [#allocation4], %s598_s13 }
  0x18   : > { %s226_s27 = sshll.u32 %s216_s26, 4  ;;  %p962_p0 = pnand %p632_p13, %p925_p3  ;;  %s958_s27 = int_to_ptr.vmem [resolvable:$true] %s226_s27 }
  0x19   : > { %s213_s30 = scalar_lea.sflag [#allocation5], %s212_s11  ;;  %s707_s14 = scalar_lea.hbm %s956_s17, 128 }
  0x1a   : > { %p708_p4 = scmp.ne.s32.totalorder %s956_s17, %s707_s14  ;;  %p709_p5 = pneg %p962_p0 }
  0x1b   : > { %s712_s6 = scalar_lea.hbm %s1081_s0, 256  ;;  %p713_p3 = scmp.lt.u32.totalorder %s956_s17, %s1081_s0 }
  0x1c   : > { %p710_p6 = pnand %p709_p5, %p708_p4  ;;  %p714_p8 = scmp.lt.u32.totalorder %s712_s6, %s707_s14 }
  0x1d   : > { %p716_p13 = scmp.lt.u32.totalorder %s707_s14, %s956_s17 }
  0x1e   : > { %p711_p7 = pneg %p710_p6  ;;  %p715_p12 = por %p714_p8, %p713_p3 }
  0x20   : > { %p717_p1 = por %p716_p13, %p715_p12 }
  0x22   : > { %p718_p2 = pnand %p717_p1, %p711_p7 }
  0x24   : > { %721 = shalt.err (!%p718_p2)
}
  0x25   : > { %s722_s11 = scalar_lea.vmem %s958_s27, 128  ;;  %s837_s13 = smov [#allocation4]  }
  0x26   : > { %p723_p4 = scmp.ne.s32.totalorder %s958_s27, %s722_s11  ;;  %s727_s15 = sshll.u32 %s837_s13, 4  ;;  %s728_s15 = int_to_ptr.vmem [resolvable:$false] %s727_s15 }
  0x27   : > { %s729_s16 = scalar_lea.vmem %s728_s15, 256  ;;  %p730_p10 = scmp.lt.s32.totalorder %s958_s27, %s728_s15 }
  0x28   : > { %p725_p6 = pnand %p723_p4, %p709_p5  ;;  %p731_p3 = scmp.lt.s32.totalorder %s729_s16, %s722_s11 }
  0x2a   : > { %p726_p11 = pneg %p725_p6  ;;  %p732_p8 = por %p731_p3, %p730_p10 }
  0x2c   : > { %p733_p12 = pnand %p732_p8, %p726_p11 }
  0x2e   : > { %736 = shalt.err (!%p733_p12)
}
  0x2f   : > { %627 = dma.hbm_to_vmem [thread:$0]  (!%p962_p0), %s956_s17, 128, %s958_s27, %s213_s30  }
  0x30   : > { %p1093_p1 = scmp.lt.s32.totalorder %s835_s25, 5  ;;  %p1094_p2 = scmp.ge.s32.totalorder %s835_s25, 1 }
  0x32   : > { %p232_p5 = pnand %p1094_p2, %p1093_p1 }
  0x33   : > { %s998_s14 = sand.u32 (!%p232_p5), 1, %s811_s19  }
  0x34   : > { %235 = sbr.rel (%p232_p5) target bundleno = 684 (0x2ac), region = 40  ;;  %s602_s6 = sshll.u32 (!%p232_p5), %s998_s14, 3 }
  0x35   : > { %s238_s26 = scalar_lea.sflag (!%p232_p5), [#allocation5], %s998_s14  ;;  %s1002_s11 = scalar_lea.vmem (!%p232_p5), [#allocation4], %s602_s6 }
  0x3b   : > { %798 = dma.done.wait (%p933_p9), %s238_s26, 128  }
  0x3c   : > { %800 = vsyncadd (%p933_p9), %s238_s26, 4294967168  ;;  %p271_p10 = scmp.eq.s32.totalorder %s819_s21, 0  ;;  %s1009_s17 = scalar_lea.vmem [#allocation7], %s602_s6 }
  0x3d   : > { %vm277_vm0 = vcmask (%p271_p10), 0   ;;  %v838_v0 = vmov (%p271_p10), 0.0  }
  0x3e   : > { %276 = sbr.rel (!%p271_p10) target bundleno = 69 (0x45), region = 48  ;;  %278 = vst.msk [vmem:[#allocation2] sm:$0x1] (%p271_p10), %vm277_vm0, %v838_v0 }
  0x45 PF: > { %p605_p11 = scmp.ne.s32.totalorder %s819_s21, 0 }
  0x46   : > { %v282_v1 = vld [vmem:[%s1002_s11] sm:$0xff] (!%p605_p11)  ;;  %vm296_vm1 = vcmask (!%p605_p11), 1043456   ;;  %v839_v3 = vmov (!%p605_p11), 0.0   ;;  %v840_v4 = vmov (!%p605_p11), 0   ;;  %vm292_vm2 = vcmask (!%p605_p11), 31744  }
  0x47   : > { %281 = sbr.rel (%p605_p11) target bundleno = 507 (0x1fb), region = 52  ;;  %v291_v2 = vcombine.high (!%p605_p11), %v282_v1, %v282_v1  ;;  %365 = vmatprep.mubr.f32.mxu0 (!%p605_p11), %v839_v3  ;;  %703 = vset.pattern.permute.xlu0 (!%p605_p11), %v840_v4  ;;  %v284_v5 = vld [vmem:[%s1083_s2] sm:$0xff] (!%p605_p11)  ;;  %v841_v7 = vmov (!%p605_p11), 1966171168   ;;  %v408_v9 = vlaneseq (!%p605_p11)  ;;  %vm387_vm3 = vcmask (!%p605_p11), 1040384  }
  0x48   : > { %v283_v6 = vld [vmem:[%s1082_s1] sm:$0xff] (!%p605_p11)  ;;  %287 = vperm.xlu0 (!%p605_p11), %703, %v284_v5   ;;  %v406_v8 = vunpack.c.l.s4 (!%p605_p11), %v841_v7  ;;  %vm402_vm5 = vcmask (!%p605_p11), 0  }
  0x49   : > { %606 = vmatprep.subr.msk.mxu0 (!%p605_p11), %vm296_vm1, %v291_v2  ;;  %v409_v12 = vshrl.u32 (!%p605_p11), %v408_v9, 7  ;;  %vm425_vm4 = vcmp.lt.s32.totalorder (!%p605_p11), %v408_v9, 256  ;;  %v380_v38 = vld [vmem:[#allocation2] sm:$0x1] (!%p605_p11) }
  0x4a   : > { %607 = vmatpush1.msk.msra.mxu0 (!%p605_p11), %vm296_vm1, %v282_v1  ;;  %v407_v11 = vunpack.c.0.s8 (!%p605_p11), %v406_v8 }
  0x4b   : > { %608 = vmatmul.mubr.msk.f32.vlgmr.msra.gmra.mrb[0].mxu0 (!%p605_p11), %vm292_vm2, %v283_v6 }
  0x4c   : > { %v410_v17 = vsub.s32 (!%p605_p11), %v407_v11, %v409_v12 }
  0xc7   : > { %v288_v10 = vpop.permute.xlu0 %287 }
 0x11e   : > { %v367_v13 = vpop.f32.mrb[0].mxu0 }
 0x11f   : > { %v368_v14 = vadd.f32 %v367_v13, %v288_v10  ;;  %v369_v15 = vpop.f32.mrb[1].mxu0 }
 0x120   : > { %v370_v16 = vadd.f32 %v369_v15, %v288_v10 }
 0x121   : > { %v374_v18 = vrot.slane %v368_v14, 6 }
 0x122   : > { %v375_v19 = vrot.slane %v370_v16, 6  ;;  %v404_v20 = vcombine.low %v368_v14, %v370_v16 }
 0x123   : > { %v378_v21 = vmul.f32 %v374_v18, %v368_v14 }
 0x124   : > { %v411_v22 = vrot.slane %v404_v20, %v410_v17  ;;  %v379_v23 = vmul.f32 %v375_v19, %v370_v16 }
 0x125   : > { %v383_v24 = vrot.slane %v378_v21, 2 }
 0x126   : > { %v412_v25 = vcombine.high %v411_v22, %v411_v22  ;;  %v384_v26 = vrot.slane %v379_v23, 2 }
 0x127   : > { %v388_v27 = vsel %vm387_vm3, %v383_v24, 0.0 }
 0x128   : > { %v419_v28 = vrot.slane %v412_v25, %v410_v17  ;;  %v389_v29 = vsel %vm387_vm3, %v384_v26, 0.0 }
 0x129   : > { %v390_v30 = vadd.f32 %v389_v29, %v388_v27 }
 0x12a   : > { %427 = vst.msk [vmem:[#allocation3] sm:$0x3] %vm425_vm4, %v419_v28 }
 0x12b   : > { %391 = vadd.xlane.f32.xlu0 %v390_v30 }
 0x1b8   : > { %v392_v31 = vpop.xlane.xlu0 %391 }
 0x1b9   : > { %v393_v32 = vrot.slane %v392_v31, 4 }
 0x1bb   : > { %v394_v33 = vadd.f32 %v393_v32, %v392_v31 }
 0x1bd   : > { %v395_v34 = vrot.slane %v394_v33, 2 }
 0x1bf   : > { %v396_v35 = vadd.f32 %v395_v34, %v394_v33 }
 0x1c1   : > { %v397_v36 = vrot.slane %v396_v35, 1 }
 0x1c3   : > { %v398_v37 = vadd.f32 %v397_v36, %v396_v35 }
 0x1c5   : > { %618 = vpush %v398_v37 }
 0x1f6   : > { %s619_s13 = spop %618 }
 0x1f7   : > { %v400_v39 = vstv %s619_s13 }
 0x1f8   : > { %v401_v40 = vadd.f32 %v400_v39, %v380_v38 }
 0x1fa   : > { %403 = vst.msk [vmem:[#allocation2] sm:$0x1] %vm402_vm5, %v401_v40 }
 0x1fb PF: > { %p609_p9 = scmp.ne.s32.totalorder %s819_s21, 1 }
 0x1fc   : > { %v437_v42 = vlaneseq (!%p609_p9)  ;;  %v842_v43 = vmov (!%p609_p9), 0   ;;  %v435_v47 = vld [vmem:[%s1084_s3] sm:$0xf] (!%p609_p9) }
 0x1fd   : > { %431 = sbr.rel (%p609_p9) target bundleno = 659 (0x293), region = 56  ;;  %705 = vset.pattern.permute.xlu0 (!%p609_p9), %v842_v43  ;;  %v464_v50 = vld [vmem:[%s1085_s4] sm:$0xf] (!%p609_p9) }
 0x1fe   : > { %v438_v45 = vshrl.u32 (!%p609_p9), %v437_v42, 7  ;;  %v445_v52 = vld [vmem:[#allocation3] sm:$0x3] (!%p609_p9)  ;;  %v432_v56 = vld [vmem:[%s1002_s11] sm:$0xff] (!%p609_p9) }
 0x1ff   : > { %v473_v59 = vcombine.high (!%p609_p9), %v432_v56, %v432_v56 }
 0x200   : > { %v439_v46 = vsub.s32 (!%p609_p9), 0, %v438_v45  ;;  %v458_v51 = vsub.s32 (!%p609_p9), 1, %v438_v45 }
 0x201   : > { %v433_v41 = vld [vmem:[#allocation2] sm:$0x1] (!%p609_p9) }
 0x202   : > { %v434_v44 = vmul.f32 (!%p609_p9), 0.00390625, %v433_v41  ;;  %v455_v53 = vrot.slane (!%p609_p9), %v445_v52, %v439_v46  ;;  %v459_v54 = vrot.slane (!%p609_p9), %v445_v52, %v458_v51 }
 0x204   : > { %v440_v48 = vrot.slane %v434_v44, %v439_v46 }
 0x206   : > { %v442_v49 = vmul.f32 %v440_v48, %v435_v47 }
 0x208   : > { %448 = vperm.xlu0 %705, %v442_v49  }
 0x20c   : > { %467 = vperm.xlu0 %705, %v464_v50  }
 0x287   : > { %v449_v55 = vpop.permute.xlu0 %448 }
 0x288   : > { %v462_v57 = vmul.f32 %v455_v53, %v449_v55  ;;  %v463_v58 = vmul.f32 %v459_v54, %v449_v55 }
 0x28b   : > { %v468_v60 = vpop.permute.xlu0 %467 }
 0x28c   : > { %v470_v61 = vadd.f32 %v468_v60, %v462_v57  ;;  %v471_v62 = vadd.f32 %v468_v60, %v463_v58 }
 0x28e   : > { %v475_v63 = vadd.f32 %v470_v61, %v432_v56  ;;  %v476_v0 = vadd.f32 %v473_v59, %v471_v62 }
 0x290   : > { %v479_v1 = vcombine.low %v475_v63, %v476_v0 }
 0x292   : > { %481 = vst [vmem:[%s1009_s17] sm:$0xff] %v479_v1 }
 0x293 PF: > { %s617_s21 = sshll.u32 %s823_s22, 7  ;;  %s500_s9 = sshll.u32 %s1009_s17, 4  ;;  %s501_s9 = int_to_ptr.vmem [resolvable:$true] %s500_s9 }
 0x294   : > { %s1032_s11 = scalar_lea.hbm %s1086_s5, %s617_s21  ;;  %s483_s30 = scalar_lea.sflag [#allocation6], %s998_s14 }
 0x295   : > { %s737_s13 = scalar_lea.vmem %s501_s9, 128  ;;  %p1095_p7 = scmp.ne.s32.totalorder %s1090_s8, 0 }
 0x296   : > { %p738_p0 = scmp.ne.s32.totalorder %s501_s9, %s737_s13  ;;  %s843_s15 = smov [#allocation7]  }
 0x297   : > { %s741_s16 = sshll.u32 %s843_s15, 4  ;;  %s742_s16 = int_to_ptr.vmem [resolvable:$false] %s741_s16 }
 0x298   : > { %p739_p13 = pnand %p738_p0, %p1095_p7  ;;  %s743_s6 = scalar_lea.vmem %s742_s16, 256 }
 0x299   : > { %p744_p6 = scmp.lt.s32.totalorder %s501_s9, %s742_s16  ;;  %p745_p3 = scmp.lt.s32.totalorder %s743_s6, %s737_s13 }
 0x29a   : > { %p740_p4 = pneg %p739_p13 }
 0x29b   : > { %p746_p8 = por %p745_p3, %p744_p6 }
 0x29d   : > { %p747_p12 = pnand %p746_p8, %p740_p4 }
 0x29f   : > { %750 = shalt.err (!%p747_p12)
}
 0x2a0   : > { %s751_s22 = scalar_lea.hbm %s1032_s11, 128  ;;  %s755_s26 = scalar_lea.hbm %s1086_s5, 256 }
 0x2a1   : > { %p752_p1 = scmp.ne.s32.totalorder %s1032_s11, %s751_s22  ;;  %p756_p10 = scmp.lt.u32.totalorder %s1032_s11, %s1086_s5 }
 0x2a2   : > { %p757_p11 = scmp.lt.u32.totalorder %s755_s26, %s751_s22  ;;  %p759_p0 = scmp.lt.u32.totalorder %s751_s22, %s1032_s11 }
 0x2a3   : > { %p753_p2 = pnand %p752_p1, %p1095_p7 }
 0x2a4   : > { %p758_p9 = por %p757_p11, %p756_p10 }
 0x2a5   : > { %p754_p5 = pneg %p753_p2 }
 0x2a6   : > { %p760_p13 = por %p759_p0, %p758_p9 }
 0x2a8   : > { %p761_p4 = pnand %p760_p13, %p754_p5 }
 0x2aa   : > { %764 = shalt.err (!%p761_p4)
}
 0x2ab   : > { %622 = dma.vmem_to_hbm [thread:$0]  (%p1095_p7), %s501_s9, 128, %s1032_s11, %s483_s30  }
 0x2ac PF: > { %p633_p6 = scmp.ge.s32.totalorder %s835_s25, 2  ;;  %s512_s27 = sand.u32 1, %s807_s18  }
 0x2ad   : > { %p1096_p3 = scmp.ne.s32.totalorder %s1091_s10, 0  ;;  %s513_s13 = scalar_lea.sflag [#allocation6], %s512_s27 }
 0x2af   : > { %p629_p8 = pnand %p633_p6, %p1096_p3 }
 0x2b1   : > { %802 = dma.done.wait (!%p629_p8), %s513_s13, 128  }
 0x2b2   : > { %804 = vsyncadd (!%p629_p8), %s513_s13, 4294967168  ;;  %s21_s25 = sadd.s32 1, %s835_s25   ;;  %s1097_s18 = smov %s811_s19 }
 0x2b3   : > { %p18_p12 = scmp.ge.s32.totalorder %s21_s25, 6   ;;  %s1098_s19 = smov %s815_s20 }
 0x2b4   : > { %s1099_s20 = smov %s950_s12  ;;  %s1100_s21 = smov %s827_s23 }
 0x2b5   : > { %s1101_s22 = smov %s831_s24  ;;  %s1102_s23 = smov %s1105_s28 }
 0x2b6   : > { %s1103_s24 = smov %s1109_s29  ;;  %20 = sbr.rel (!%p18_p12) target bundleno = 7 (0x7), region = 99 }
 0x2bd   :  { %518 = vsyncpa [#allocation5], 1 }
 0x2be   :  { %520 = vsyncpa [#allocation5 + $0x1], 1 }
 0x2bf   :  { %521 = vsyncpa [#allocation6], 1 }
 0x2c0   :  { %523 = vsyncpa [#allocation6 + $0x1], 1 }

</bundles_post_ra>
